<compile_context>
chip_gen: v6e
topology: v6e:2x2x1
jax: 0.10.0
libtpu: 0.0.40
codegen_flags: <defaults>
</compile_context>

<pallas_src>
import functools
import math

import jax
import jax.numpy as jnp
from jax.experimental import pallas as pl
from jax.experimental.pallas import tpu as pltpu

_LANES = 128


def _cdiv(a, b):
    return (a + b - 1) // b


def _mask_iou_partial_kernel(logits_ref, gt_ref, out_ref, *,
                             C, HW, TS, sig_tbl, need_mask):
    """One grid step: fused channel-argmax -> sigmoid-of-index -> partial sums.

    logits_ref : (TB, C, TS, 128)  native dtype
    gt_ref     : (TB, TS, 128)     native dtype (spatially zero-padded)
    out_ref    : (1, 1, 3, 128)    f32; rows = [sum(p), sum(gt), sum(p*gt)]
                                   reduced over (TB, TS), kept lane-wise.
    """
    x = logits_ref[...]                                  # (TB, C, TS, 128)

    # argmax over channels, with sigmoid(class index) folded in as constants.
    best = x[:, 0].astype(jnp.float32)                   # (TB, TS, 128)
    p = jnp.full(best.shape, sig_tbl[0], dtype=jnp.float32)
    for c in range(1, C):                                # C is small & static
        xc = x[:, c].astype(jnp.float32)
        cond = xc > best                                 # first occurrence wins
        best = jnp.where(cond, xc, best)
        p = jnp.where(cond, jnp.float32(sig_tbl[c]), p)

    g = gt_ref[...].astype(jnp.float32)                  # (TB, TS, 128)

    if need_mask:
        # Zero out the spatial padding contribution of p (gt is already
        # zero-padded in the wrapper, so only p needs masking).
        t = pl.program_id(1)
        rows = jax.lax.broadcasted_iota(jnp.int32, p.shape, dimension=1)
        lanes = jax.lax.broadcasted_iota(jnp.int32, p.shape, dimension=2)
        lin = (t * TS + rows) * _LANES + lanes
        p = jnp.where(lin < HW, p, jnp.float32(0.0))

    out_ref[0, 0, 0:1, :] = jnp.sum(p, axis=(0, 1), keepdims=True)[0]
    out_ref[0, 0, 1:2, :] = jnp.sum(g, axis=(0, 1), keepdims=True)[0]
    out_ref[0, 0, 2:3, :] = jnp.sum(p * g, axis=(0, 1), keepdims=True)[0]


def mask_iou_loss(logits, ground_truth_mask, pred_iou):
    """logits: [B,C,H,W]; ground_truth_mask: [B,H,W] (or [B,1,H,W]);
    pred_iou: [B,1] -> scalar loss."""
    B, C, H, W = logits.shape
    assert ground_truth_mask.size == B * H * W, \
        "pred_mask and ground_truth_mask should have the same shape."
    HW = H * W

    gt = ground_truth_mask.reshape(B, HW)
    if gt.dtype == jnp.bool_:
        gt = gt.astype(jnp.int8)                          # avoid bool VMEM refs
    lg = logits.reshape(B, C, HW)                         # contiguous, free

    # --- spatial tiling: (rows, 128) lane-dense tiles, ~2 MiB of logits/step.
    ROWS = _cdiv(HW, _LANES)
    itemsize = jnp.dtype(logits.dtype).itemsize
    bytes_per_row = C * _LANES * itemsize
    TILE_BUDGET = 2 * 1024 * 1024
    max_ts = max(8, min(2048, (TILE_BUDGET // bytes_per_row) // 8 * 8))

    if ROWS <= max_ts:
        TS, NT, ROWS_PAD = ROWS, 1, ROWS
    else:
        TS = max_ts
        NT = _cdiv(ROWS, TS)
        ROWS_PAD = NT * TS

    pad = ROWS_PAD * _LANES - HW
    if pad:
        lg = jnp.pad(lg, ((0, 0), (0, 0), (0, pad)))
        gt = jnp.pad(gt, ((0, 0), (0, pad)))
    logits3 = lg.reshape(B, C, ROWS_PAD, _LANES)
    gt3 = gt.reshape(B, ROWS_PAD, _LANES)

    # --- batch blocking: amortize the ~0.35us/step overhead on small masks.
    TB = 1
    if NT == 1:
        per_b_bytes = C * TS * _LANES * itemsize
        for tb in range(B, 0, -1):
            if B % tb == 0 and tb * per_b_bytes <= TILE_BUDGET:
                TB = tb
                break
    NB = B // TB

    sig_tbl = tuple(1.0 / (1.0 + math.exp(-float(c))) for c in range(C))
    kernel = functools.partial(
        _mask_iou_partial_kernel,
        C=C, HW=HW, TS=TS, sig_tbl=sig_tbl, need_mask=(pad > 0))

    partials = pl.pallas_call(
        kernel,
        out_shape=jax.ShapeDtypeStruct((NB, NT, 3, _LANES), jnp.float32),
        grid_spec=pltpu.PrefetchScalarGridSpec(
            num_scalar_prefetch=0,
            grid=(NB, NT),
            in_specs=[
                pl.BlockSpec((TB, C, TS, _LANES), lambda b, t: (b, 0, t, 0)),
                pl.BlockSpec((TB, TS, _LANES), lambda b, t: (b, t, 0)),
            ],
            out_specs=pl.BlockSpec((1, 1, 3, _LANES),
                                   lambda b, t: (b, t, 0, 0)),
        ),
        compiler_params=pltpu.CompilerParams(
            dimension_semantics=("parallel", "parallel")),
    )(logits3, gt3)

    # Tiny JAX epilogue: global scalar iou + MSE against pred_iou.
    sum_p = jnp.sum(partials[:, :, 0, :])
    sum_g = jnp.sum(partials[:, :, 1, :])
    inter = jnp.sum(partials[:, :, 2, :])
    union = sum_p + sum_g - inter
    iou = (inter + jnp.float32(1e-7)) / (union + jnp.float32(1e-7))
    return jnp.mean((iou - pred_iou.astype(jnp.float32)) ** 2)


def _reference(logits, gt, pred_iou):
    pm = jnp.argmax(logits, axis=1).astype(jnp.float32)
    p = jax.nn.sigmoid(pm)
    g = gt.astype(jnp.float32)
    inter = jnp.sum(p * g)
    union = jnp.sum(p) + jnp.sum(g) - inter
    iou = (inter + 1e-7) / (union + 1e-7)
    return jnp.mean((iou - pred_iou.astype(jnp.float32)) ** 2)


if __name__ == "__main__":
    key = jax.random.PRNGKey(0)

    # Test 1: f32 logits, HW divisible by 128 (fast path, batched grid step).
    k1, k2, k3, key = jax.random.split(key, 4)
    B, C, H, W = 2, 4, 16, 16
    logits = jax.random.normal(k1, (B, C, H, W), jnp.float32)
    gt = (jax.random.uniform(k2, (B, H, W)) > 0.5).astype(jnp.float32)
    pred_iou = jax.random.uniform(k3, (B, 1), dtype=jnp.float32)

    loss = jax.block_until_ready(mask_iou_loss(logits, gt, pred_iou))
    ref = _reference(logits, gt, pred_iou)
    assert jnp.allclose(loss, ref, rtol=1e-5, atol=1e-6), (loss, ref)

    # Test 2: bf16 logits + non-128-divisible spatial size (padding/mask path,
    # in-kernel dtype cast).
    k1, k2, k3, key = jax.random.split(key, 4)
    B2, C2, H2, W2 = 3, 5, 10, 12
    logits2 = jax.random.normal(k1, (B2, C2, H2, W2), jnp.bfloat16)
    gt2 = (jax.random.uniform(k2, (B2, H2, W2)) > 0.5).astype(jnp.float32)
    pred_iou2 = jax.random.uniform(k3, (B2, 1), dtype=jnp.float32)

    loss2 = jax.block_until_ready(mask_iou_loss(logits2, gt2, pred_iou2))
    ref2 = _reference(logits2, gt2, pred_iou2)
    assert jnp.allclose(loss2, ref2, rtol=1e-5, atol=1e-6), (loss2, ref2)

    print("KERNEL_OK")
</pallas_src>

<mosaic_0001>
module attributes {stable_mosaic.version = 11 : i64} {
  func.func @_mask_iou_partial_kernel(%arg0: i32, %arg1: i32, %arg2: memref<2x4x2x128xf32, #tpu.memory_space<vmem>>, %arg3: memref<2x2x128xf32, #tpu.memory_space<vmem>>, %arg4: memref<1x1x3x128xf32, #tpu.memory_space<vmem>>) attributes {dimension_semantics = [#tpu.dimension_semantics<parallel>, #tpu.dimension_semantics<parallel>], iteration_bounds = array<i64: 1, 1>, scalar_prefetch = 0 : i64, scratch_operands = 0 : i64, tpu.core_type = #tpu.core_type<tc>, window_params = [{transform_indices = @transform_0, window_bounds = array<i64: 2, 4, 2, 128>}, {transform_indices = @transform_1, window_bounds = array<i64: 2, 2, 128>}, {transform_indices = @transform_2, window_bounds = array<i64: 1, 1, 3, 128>}]} {
    %c0 = arith.constant 0 : index
    %c0_0 = arith.constant 0 : index
    %c0_1 = arith.constant 0 : index
    %c0_2 = arith.constant 0 : index
    %0 = vector.load %arg2[%c0, %c0_0, %c0_1, %c0_2] : memref<2x4x2x128xf32, #tpu.memory_space<vmem>>, vector<2x4x2x128xf32>
    %1 = vector.extract_strided_slice %0 {offsets = [0, 0, 0, 0], sizes = [2, 1, 2, 128], strides = [1, 1, 1, 1]} : vector<2x4x2x128xf32> to vector<2x1x2x128xf32>
    %2 = vector.shape_cast %1 : vector<2x1x2x128xf32> to vector<2x2x128xf32>
    %cst = arith.constant 5.000000e-01 : f32
    %3 = vector.broadcast %cst : f32 to vector<2x2x128xf32>
    %4 = vector.extract_strided_slice %0 {offsets = [0, 1, 0, 0], sizes = [2, 1, 2, 128], strides = [1, 1, 1, 1]} : vector<2x4x2x128xf32> to vector<2x1x2x128xf32>
    %5 = vector.shape_cast %4 : vector<2x1x2x128xf32> to vector<2x2x128xf32>
    %6 = arith.cmpf ogt, %5, %2 : vector<2x2x128xf32>
    %7 = arith.select %6, %5, %2 : vector<2x2x128xi1>, vector<2x2x128xf32>
    %cst_3 = arith.constant 0.731058597 : f32
    %8 = vector.broadcast %cst_3 : f32 to vector<2x2x128xf32>
    %9 = arith.select %6, %8, %3 : vector<2x2x128xi1>, vector<2x2x128xf32>
    %10 = vector.extract_strided_slice %0 {offsets = [0, 2, 0, 0], sizes = [2, 1, 2, 128], strides = [1, 1, 1, 1]} : vector<2x4x2x128xf32> to vector<2x1x2x128xf32>
    %11 = vector.shape_cast %10 : vector<2x1x2x128xf32> to vector<2x2x128xf32>
    %12 = arith.cmpf ogt, %11, %7 : vector<2x2x128xf32>
    %13 = arith.select %12, %11, %7 : vector<2x2x128xi1>, vector<2x2x128xf32>
    %cst_4 = arith.constant 0.880797088 : f32
    %14 = vector.broadcast %cst_4 : f32 to vector<2x2x128xf32>
    %15 = arith.select %12, %14, %9 : vector<2x2x128xi1>, vector<2x2x128xf32>
    %16 = vector.extract_strided_slice %0 {offsets = [0, 3, 0, 0], sizes = [2, 1, 2, 128], strides = [1, 1, 1, 1]} : vector<2x4x2x128xf32> to vector<2x1x2x128xf32>
    %17 = vector.shape_cast %16 : vector<2x1x2x128xf32> to vector<2x2x128xf32>
    %18 = arith.cmpf ogt, %17, %13 : vector<2x2x128xf32>
    %cst_5 = arith.constant 0.952574133 : f32
    %19 = vector.broadcast %cst_5 : f32 to vector<2x2x128xf32>
    %20 = arith.select %18, %19, %15 : vector<2x2x128xi1>, vector<2x2x128xf32>
    %c0_6 = arith.constant 0 : index
    %c0_7 = arith.constant 0 : index
    %c0_8 = arith.constant 0 : index
    %21 = vector.load %arg3[%c0_6, %c0_7, %c0_8] : memref<2x2x128xf32, #tpu.memory_space<vmem>>, vector<2x2x128xf32>
    %cst_9 = arith.constant dense<0.000000e+00> : vector<128xf32>
    %22 = vector.multi_reduction <add>, %20, %cst_9 [0, 1] : vector<2x2x128xf32> to vector<128xf32>
    %23 = vector.shape_cast %22 : vector<128xf32> to vector<1x1x128xf32>
    %24 = vector.shape_cast %23 : vector<1x1x128xf32> to vector<1x128xf32>
    %c0_10 = arith.constant 0 : index
    %c0_11 = arith.constant 0 : index
    %c0_12 = arith.constant 0 : index
    %c0_13 = arith.constant 0 : index
    %25 = vector.load %arg4[%c0_10, %c0_11, %c0_12, %c0_13] : memref<1x1x3x128xf32, #tpu.memory_space<vmem>>, vector<1x1x1x128xf32>
    %26 = vector.shape_cast %25 : vector<1x1x1x128xf32> to vector<1x128xf32>
    %27 = vector.shape_cast %24 : vector<1x128xf32> to vector<1x1x1x128xf32>
    tpu.vector_store %arg4[%c0_10, %c0_11, %c0_12, %c0_13], %27 {strides = array<i32>} : memref<1x1x3x128xf32, #tpu.memory_space<vmem>>, vector<1x1x1x128xf32>,
    %cst_14 = arith.constant dense<0.000000e+00> : vector<128xf32>
    %28 = vector.multi_reduction <add>, %21, %cst_14 [0, 1] : vector<2x2x128xf32> to vector<128xf32>
    %29 = vector.shape_cast %28 : vector<128xf32> to vector<1x1x128xf32>
    %30 = vector.shape_cast %29 : vector<1x1x128xf32> to vector<1x128xf32>
    %c0_15 = arith.constant 0 : index
    %c0_16 = arith.constant 0 : index
    %c1 = arith.constant 1 : index
    %c0_17 = arith.constant 0 : index
    %31 = vector.load %arg4[%c0_15, %c0_16, %c1, %c0_17] : memref<1x1x3x128xf32, #tpu.memory_space<vmem>>, vector<1x1x1x128xf32>
    %32 = vector.shape_cast %31 : vector<1x1x1x128xf32> to vector<1x128xf32>
    %33 = vector.shape_cast %30 : vector<1x128xf32> to vector<1x1x1x128xf32>
    tpu.vector_store %arg4[%c0_15, %c0_16, %c1, %c0_17], %33 {strides = array<i32>} : memref<1x1x3x128xf32, #tpu.memory_space<vmem>>, vector<1x1x1x128xf32>,
    %34 = arith.mulf %20, %21 : vector<2x2x128xf32>
    %cst_18 = arith.constant dense<0.000000e+00> : vector<128xf32>
    %35 = vector.multi_reduction <add>, %34, %cst_18 [0, 1] : vector<2x2x128xf32> to vector<128xf32>
    %36 = vector.shape_cast %35 : vector<128xf32> to vector<1x1x128xf32>
    %37 = vector.shape_cast %36 : vector<1x1x128xf32> to vector<1x128xf32>
    %c0_19 = arith.constant 0 : index
    %c0_20 = arith.constant 0 : index
    %c2 = arith.constant 2 : index
    %c0_21 = arith.constant 0 : index
    %38 = vector.load %arg4[%c0_19, %c0_20, %c2, %c0_21] : memref<1x1x3x128xf32, #tpu.memory_space<vmem>>, vector<1x1x1x128xf32>
    %39 = vector.shape_cast %38 : vector<1x1x1x128xf32> to vector<1x128xf32>
    %40 = vector.shape_cast %37 : vector<1x128xf32> to vector<1x1x1x128xf32>
    tpu.vector_store %arg4[%c0_19, %c0_20, %c2, %c0_21], %40 {strides = array<i32>} : memref<1x1x3x128xf32, #tpu.memory_space<vmem>>, vector<1x1x1x128xf32>,
    return
  }
  func.func @transform_0(%arg0: i32, %arg1: i32) -> (i32, i32, i32, i32) {
    %c0_i32 = arith.constant 0 : i32
    %c0_i32_0 = arith.constant 0 : i32
    %c0_i32_1 = arith.constant 0 : i32
    return %arg0, %c0_i32, %arg1, %c0_i32_0 : i32, i32, i32, i32
  }
  func.func @transform_1(%arg0: i32, %arg1: i32) -> (i32, i32, i32) {
    %c0_i32 = arith.constant 0 : i32
    %c0_i32_0 = arith.constant 0 : i32
    return %arg0, %arg1, %c0_i32 : i32, i32, i32
  }
  func.func @transform_2(%arg0: i32, %arg1: i32) -> (i32, i32, i32, i32) {
    %c0_i32 = arith.constant 0 : i32
    %c0_i32_0 = arith.constant 0 : i32
    %c0_i32_1 = arith.constant 0 : i32
    return %arg0, %arg1, %c0_i32, %c0_i32_0 : i32, i32, i32, i32
  }
}

</mosaic_0001>

<bundles_post_ra>
// kernel: tpu_custom_call.1
= control target key start
LH: loop header
LB: loop body
LE: loop exit
PB: predicated region body
PF: predicated region fallthrough
CT: control target
= control target key end

     0   :  { %7 = vsyncpa [#allocation3], 0  ;;  %s194_s0 = inlined_call_operand.hbm [shape: f32[2,4,2,128], index: 0, kind: input, shape index: {}]   ;;  %s195_s1 = inlined_call_operand.hbm [shape: f32[2,2,128], index: 1, kind: input, shape index: {}]   ;;  %s196_s2 = inlined_call_operand.vmem [shape: f32[1,1,3,128], index: 2, kind: output, shape index: {}]  }
   0x1   :  { %8 = vsyncpa [#allocation5], 0  ;;  %s153_s9 = smov [#allocation2]  }
   0x2   :  { %s14_s10 = sshll.u32 %s153_s9, 4  ;;  %s15_s10 = int_to_ptr.vmem [resolvable:$true] %s14_s10 }
   0x3   :  { %s117_s11 = scalar_lea.vmem %s15_s10, 256  ;;  %p122_p1 = scmp.lt.s32.totalorder %s15_s10, %s15_s10 }
   0x4   :  { %p118_p0 = scmp.ne.s32.totalorder %s15_s10, %s117_s11  ;;  %p123_p2 = scmp.lt.s32.totalorder %s117_s11, %s117_s11 }
   0x6   :  { %p124_p3 = por %p123_p2, %p122_p1 }
   0x8   :  { %p125_p4 = pnand %p124_p3, %p118_p0 }
   0xa   :  { %128 = shalt.err (!%p125_p4)
}
   0xb   :  { %s154_s12 = smov 32   ;;  %s155_s13 = smov 2  }
   0xc   :  { %20 = dma.hbm_to_vmem [thread:$0]  %s194_s0, 256, %s15_s10, [#allocation3], %s154_s12, %s154_s12, %s155_s13  }
   0xd   :  { %s156_s16 = smov [#allocation4]  }
   0xe   :  { %s26_s17 = sshll.u32 %s156_s16, 4  ;;  %s27_s17 = int_to_ptr.vmem [resolvable:$true] %s26_s17 }
   0xf   :  { %s137_s18 = scalar_lea.vmem %s27_s17, 64  ;;  %p142_p6 = scmp.lt.s32.totalorder %s27_s17, %s27_s17 }
  0x10   :  { %p138_p5 = scmp.ne.s32.totalorder %s27_s17, %s137_s18  ;;  %p143_p7 = scmp.lt.s32.totalorder %s137_s18, %s137_s18 }
  0x12   :  { %p144_p8 = por %p143_p7, %p142_p6 }
  0x14   :  { %p145_p9 = pnand %p144_p8, %p138_p5 }
  0x16   :  { %148 = shalt.err (!%p145_p9)
}
  0x17   :  { %32 = dma.hbm_to_vmem [thread:$0]  %s195_s1, 64, %s27_s17, [#allocation5], %s154_s12, %s154_s12, %s155_s13  }
  0x18   :  { %149 = dma.done.wait [#allocation3], 256  }
  0x19   :  { %150 = vsyncadd [#allocation3], 4294967040 }
  0x1a   :  { %151 = dma.done.wait [#allocation5], 64  }
  0x1b   :  { %152 = vsyncadd [#allocation5], 4294967232  ;;  %v39_v0 = vld [vmem:[#allocation2] sm:$0x3]  ;;  %v40_v1 = vld [vmem:[#allocation2 + $0x2] sm:$0x3] }
  0x1c   :  { %v41_v2 = vld [vmem:[#allocation2 + $0x4] sm:$0x3]  ;;  %v43_v3 = vld [vmem:[#allocation2 + $0x8] sm:$0x3]  ;;  %v44_v4 = vld [vmem:[#allocation2 + $0xa] sm:$0x3]  ;;  %vm47_vm0 = vcmp.gt.f32.partialorder %v40_v1, %v39_v0 }
  0x1d   :  { %vm65_vm1 = vcmask 1041408   ;;  %v42_v5 = vld [vmem:[#allocation2 + $0x6] sm:$0x3]  ;;  %v45_v6 = vld [vmem:[#allocation2 + $0xc] sm:$0x3]  ;;  %vm48_vm2 = vcmp.gt.f32.partialorder %v44_v4, %v43_v3  ;;  %v49_v7 = vsel %vm47_vm0, %v40_v1, %v39_v0  ;;  %v157_v8 = vmov 0.5  }
  0x1e   :  { %v51_v9 = vsel %vm47_vm0, 0.7310586, %v157_v8  ;;  %v46_v10 = vld [vmem:[#allocation2 + $0xe] sm:$0x3]  ;;  %v50_v11 = vsel %vm48_vm2, %v44_v4, %v43_v3  ;;  %v52_v12 = vsel %vm48_vm2, 0.7310586, %v157_v8  ;;  %vm53_vm3 = vcmp.gt.f32.partialorder %v41_v2, %v49_v7 }
  0x1f   :  { %v63_v13 = vld [vmem:[#allocation4] sm:$0x3]  ;;  %vm54_vm4 = vcmp.gt.f32.partialorder %v45_v6, %v50_v11  ;;  %v55_v14 = vsel %vm53_vm3, %v41_v2, %v49_v7  ;;  %v57_v15 = vsel %vm53_vm3, 0.8807971, %v51_v9  ;;  %v64_v16 = vld [vmem:[#allocation4 + $0x2] sm:$0x3] }
  0x20   :  { %v76_v17 = vsel %vm65_vm1, %v63_v13, 0.0  ;;  %v56_v18 = vsel %vm54_vm4, %v45_v6, %v50_v11  ;;  %v58_v19 = vsel %vm54_vm4, 0.8807971, %v52_v12  ;;  %vm59_vm5 = vcmp.gt.f32.partialorder %v42_v5, %v55_v14 }
  0x21   :  { %v77_v20 = vsel %vm65_vm1, %v64_v16, 0.0  ;;  %vm60_vm6 = vcmp.gt.f32.partialorder %v46_v10, %v56_v18  ;;  %v61_v21 = vsel %vm59_vm5, 0.95257413, %v57_v15 }
  0x22   :  { %v78_v22 = vadd.f32 %v77_v20, %v76_v17  ;;  %v62_v23 = vsel %vm60_vm6, 0.95257413, %v58_v19  ;;  %v66_v24 = vsel %vm65_vm1, %v61_v21, 0.0  ;;  %v86_v25 = vmul.f32 %v63_v13, %v61_v21 }
  0x23   :  { %v67_v26 = vsel %vm65_vm1, %v62_v23, 0.0  ;;  %v87_v28 = vmul.f32 %v64_v16, %v62_v23 }
  0x24   :  { %v79_v27 = vrot.slane %v78_v22, 4  ;;  %v68_v29 = vadd.f32 %v67_v26, %v66_v24  ;;  %v88_v30 = vsel %vm65_vm1, %v86_v25, 0.0 }
  0x25   :  { %v89_v32 = vsel %vm65_vm1, %v87_v28, 0.0 }
  0x26   :  { %v80_v31 = vadd.f32 %v79_v27, %v78_v22  ;;  %v69_v33 = vrot.slane %v68_v29, 4  ;;  %v90_v34 = vadd.f32 %v89_v32, %v88_v30 }
  0x28   :  { %v81_v35 = vrot.slane %v80_v31, 2  ;;  %v70_v36 = vadd.f32 %v69_v33, %v68_v29  ;;  %v91_v37 = vrot.slane %v90_v34, 4 }
  0x2a   :  { %v82_v38 = vadd.f32 %v81_v35, %v80_v31  ;;  %v71_v39 = vrot.slane %v70_v36, 2  ;;  %v92_v40 = vadd.f32 %v91_v37, %v90_v34 }
  0x2c   :  { %v83_v41 = vrot.slane %v82_v38, 1  ;;  %v72_v42 = vadd.f32 %v71_v39, %v70_v36  ;;  %v93_v43 = vrot.slane %v92_v40, 2 }
  0x2e   :  { %v84_v44 = vadd.f32 %v83_v41, %v82_v38  ;;  %v73_v45 = vrot.slane %v72_v42, 1  ;;  %v94_v46 = vadd.f32 %v93_v43, %v92_v40 }
  0x30   :  { %85 = vst [vmem:[%s196_s2 + $0x1] sm:$0x1] %v84_v44  ;;  %v74_v47 = vadd.f32 %v73_v45, %v72_v42  ;;  %v95_v48 = vrot.slane %v94_v46, 1 }
  0x32   :  { %75 = vst [vmem:[%s196_s2] sm:$0x1] %v74_v47  ;;  %v96_v49 = vadd.f32 %v95_v48, %v94_v46 }
  0x34   :  { %97 = vst [vmem:[%s196_s2 + $0x2] sm:$0x1] %v96_v49 }
  0x35   :  { %102 = vsyncpa [#allocation3], 1 }
  0x36   :  { %103 = vsyncpa [#allocation5], 1 }

</bundles_post_ra>
